<compile_context>
chip_gen: v6e
topology: v6e:2x2x1
jax: 0.10.0
libtpu: 0.0.40
codegen_flags: <defaults>
</compile_context>

<pallas_src>
import jax
import jax.numpy as jnp
from jax.experimental import pallas as pl
from jax.experimental.pallas import tpu as pltpu

_LANE = 128
_MiB = 1024 * 1024


def _round_up(v, m):
    return ((v + m - 1) // m) * m


def _router_kernel(x_ref, w_ref, o_ref):
    # x_ref: (tm, H)  tokens on sublanes, hidden on lanes
    # w_ref: (H, E)   pre-transposed -> MXU RHS is already (K, N)
    # o_ref: (tm, E)
    o_ref[...] = jnp.dot(
        x_ref[...], w_ref[...], preferred_element_type=jnp.float32
    ).astype(o_ref.dtype)


def _chip_config():
    """Return (vmem_capacity_bytes, is_small_vmem, num_tensorcores) with safe fallbacks."""
    vmem_cap = None
    try:
        vmem_cap = int(pltpu.get_tpu_info().vmem_capacity_bytes)
    except Exception:
        vmem_cap = None
    kind = ""
    try:
        kind = jax.devices()[0].device_kind.lower()
    except Exception:
        pass
    if vmem_cap is None:
        vmem_cap = 64 * _MiB  # conservative: assume the smallest-VMEM generation (v7x)
    small_vmem = vmem_cap <= 96 * _MiB
    # v7x (and v4 megacore) shard "parallel" grid axes across 2 TensorCores.
    num_tc = 2 if (small_vmem or "v7" in kind or "v4" in kind) else 1
    return vmem_cap, small_vmem, num_tc


def router_forward(hidden_states, router_weight, *, small_t_threshold=256,
                   logits_dtype=None, max_tile_tokens=None):
    """Pallas implementation of Router.forward.

    hidden_states: (..., hidden_size).  Pass activations in their native dtype
        (bf16 halves the HBM traffic; the MXU accumulates in f32 either way).
    router_weight: (num_experts, hidden_size) -- nn.Linear.weight layout.
    logits_dtype:  dtype of returned logits; defaults to the activation dtype
        (nn.Linear semantics).  Pass jnp.float32 for f32 routing logits.
    max_tile_tokens: optional cap on the token tile (tuning/testing knob).
    returns: (num_tokens, num_experts) logits.
    """
    hidden_size = hidden_states.shape[-1]
    num_experts, w_hidden = router_weight.shape
    assert w_hidden == hidden_size, "weight hidden dim mismatch"
    out_dtype = hidden_states.dtype if logits_dtype is None else logits_dtype

    x = hidden_states.reshape(-1, hidden_size)
    num_tokens = x.shape[0]

    # Small-T fast path (decode-time routing): launch + single-step fixed cost
    # dominates the sub-microsecond matmul; let XLA fuse it.
    if num_tokens <= small_t_threshold:
        logits = jax.lax.dot_general(
            x, router_weight,
            dimension_numbers=(((1,), (1,)), ((), ())),
            preferred_element_type=jnp.float32)
        return logits.astype(out_dtype)

    # One tiny wrapper-side transpose so the kernel RHS is (K, N) = (H, E);
    # avoids any per-step weight relayout through the XLU inside the kernel.
    w_t = jnp.transpose(router_weight)  # (H, E)

    x_bytes = jnp.dtype(x.dtype).itemsize
    w_bytes = jnp.dtype(w_t.dtype).itemsize
    o_bytes = jnp.dtype(out_dtype).itemsize

    # ---- Generation-aware VMEM budget -----------------------------------
    vmem_cap, small_vmem, num_tc = _chip_config()
    if small_vmem:
        # v7x: 64 MiB physical per TensorCore -> cap the scoped limit at 52 MiB.
        limit_cap = min(vmem_cap, 52 * _MiB)
    else:
        # v5e/v6e: 128 MiB physical (scoped default is only 16/32 MiB).
        limit_cap = min(vmem_cap - 16 * _MiB, 112 * _MiB)
    tile_budget = limit_cap - 6 * _MiB

    # ---- Lane/sublane-padded VMEM accounting -----------------------------
    x_sub = max(8, 32 // x_bytes)            # sublane multiple: 8 f32, 16 bf16, 32 int8
    w_sub = max(8, 32 // w_bytes)
    h_lanes = _round_up(hidden_size, _LANE)
    e_lanes = _round_up(num_experts, _LANE)  # (tm, E) output pads to 128 lanes
    x_row = h_lanes * x_bytes                # VMEM bytes per token of x
    o_row = e_lanes * o_bytes                # VMEM bytes per token of output
    X_BUFFERS, O_BUFFERS, W_BUFFERS = 3, 2, 2
    w_tile = W_BUFFERS * _round_up(hidden_size, w_sub) * e_lanes * w_bytes

    def tile_vmem_bytes(tm):
        return X_BUFFERS * tm * x_row + O_BUFFERS * tm * o_row + w_tile

    # ---- Token-tile selection ---------------------------------------------
    per_token = X_BUFFERS * x_row + O_BUFFERS * o_row
    tm_max = max(x_sub, ((tile_budget - w_tile) // per_token) // x_sub * x_sub)
    if max_tile_tokens is not None:
        tm_max = max(x_sub, min(tm_max, (max_tile_tokens // x_sub) * x_sub))

    # Largest tile that fits, then rebalance the step count so both v7x
    # TensorCores stream equal bytes; single-TC chips may take one full step.
    n_steps = max(1, pl.cdiv(num_tokens, tm_max))
    if num_tc > 1:
        n_steps = _round_up(n_steps, num_tc)
    tm = _round_up(pl.cdiv(num_tokens, n_steps), x_sub)
    if tm >= num_tokens:
        tm = num_tokens  # full-array block dim is always legal
    grid = (pl.cdiv(num_tokens, tm),)

    needed = tile_vmem_bytes(tm)
    vmem_limit = int(min(limit_cap, max(32 * _MiB, needed + needed // 4 + 2 * _MiB)))

    cost = pl.CostEstimate(
        flops=2 * num_tokens * hidden_size * num_experts,
        transcendentals=0,
        bytes_accessed=(num_tokens * hidden_size * x_bytes
                        + num_experts * hidden_size * w_bytes
                        + num_tokens * num_experts * o_bytes),
    )
    out_shape = jax.ShapeDtypeStruct((num_tokens, num_experts), out_dtype)

    def build(x_buffers):
        if x_buffers == 2:
            x_spec = pl.BlockSpec((tm, hidden_size), lambda i: (i, 0))
        else:
            x_spec = pl.BlockSpec((tm, hidden_size), lambda i: (i, 0),
                                  pipeline_mode=pl.Buffered(x_buffers))
        return pl.pallas_call(
            _router_kernel,
            out_shape=out_shape,
            grid_spec=pltpu.PrefetchScalarGridSpec(
                num_scalar_prefetch=0,
                grid=grid,
                in_specs=[
                    x_spec,
                    # Full weight resident; constant index_map -> fetched once.
                    pl.BlockSpec((hidden_size, num_experts), lambda i: (0, 0)),
                ],
                out_specs=pl.BlockSpec((tm, num_experts), lambda i: (i, 0)),
            ),
            compiler_params=pltpu.CompilerParams(
                dimension_semantics=("parallel",),
                vmem_limit_bytes=vmem_limit,
            ),
            cost_estimate=cost,
        )

    # A 3rd x buffer only helps when the grid is deep enough to stream.
    x_buffers = 3 if grid[0] >= 3 else 2
    try:
        return build(x_buffers)(x, w_t)
    except Exception:
        if x_buffers == 2:
            raise
        # pipeline_mode=pl.Buffered not supported on this jax build -> default
        # 2-deep pipeline (tile sizing already fits either way).
        return build(2)(x, w_t)


if __name__ == "__main__":
    key = jax.random.PRNGKey(0)
    k_x, k_w, k_x2, k_w2 = jax.random.split(key, 4)

    # --- Test 1: module-sized small shape, forced through the Pallas path. ---
    batch, seq, hidden_size, num_experts = 2, 8, 32, 8
    hidden_states = jax.random.normal(
        k_x, (batch, seq, hidden_size), dtype=jnp.float32)
    bound = 1.0 / (hidden_size ** 0.5)
    router_weight = jax.random.uniform(
        k_w, (num_experts, hidden_size),
        minval=-bound, maxval=bound, dtype=jnp.float32)

    logits = router_forward(hidden_states, router_weight, small_t_threshold=0)
    jax.block_until_ready(logits)
    ref = hidden_states.reshape(-1, hidden_size) @ router_weight.T
    assert logits.shape == (batch * seq, num_experts)
    assert jnp.allclose(logits, ref, atol=1e-4, rtol=1e-4)

    # Default call at this size takes the small-T XLA fast path; check it too.
    logits_fast = router_forward(hidden_states, router_weight)
    jax.block_until_ready(logits_fast)
    assert jnp.allclose(logits_fast, ref, atol=1e-4, rtol=1e-4)

    # --- Test 2: larger token count -> balanced multi-step grid + ragged tail. ---
    b2, s2, h2, e2 = 3, 500, 32, 8          # 1500 tokens
    hs2 = jax.random.normal(k_x2, (b2, s2, h2), dtype=jnp.float32)
    bound2 = 1.0 / (h2 ** 0.5)
    w2 = jax.random.uniform(
        k_w2, (e2, h2), minval=-bound2, maxval=bound2, dtype=jnp.float32)

    logits2 = router_forward(hs2, w2)
    jax.block_until_ready(logits2)
    ref2 = hs2.reshape(-1, h2) @ w2.T
    assert logits2.shape == (b2 * s2, e2)
    assert jnp.allclose(logits2, ref2, atol=1e-4, rtol=1e-4)

    # --- Test 3: bf16 activations (half the HBM traffic), f32 routing logits. ---
    hs3 = hs2.astype(jnp.bfloat16)
    logits3 = router_forward(hs3, w2, logits_dtype=jnp.float32)
    jax.block_until_ready(logits3)
    ref3 = hs3.astype(jnp.float32).reshape(-1, h2) @ w2.T
    assert logits3.dtype == jnp.float32
    assert jnp.allclose(logits3, ref3, atol=2e-2, rtol=2e-2)

    # --- Test 4: force a deeper grid (>=3 steps) to exercise the 3-deep
    #     input pipeline (or its graceful fallback) and tail masking. ---
    logits4 = router_forward(hs2, w2, max_tile_tokens=512)
    jax.block_until_ready(logits4)
    assert jnp.allclose(logits4, ref2, atol=1e-4, rtol=1e-4)

    print("KERNEL_OK")
</pallas_src>

<mosaic_0001>
module attributes {stable_mosaic.version = 11 : i64} {
  func.func @_router_kernel(%arg0: i32, %arg1: memref<8x32xf32, #tpu.memory_space<vmem>>, %arg2: memref<32x8xf32, #tpu.memory_space<vmem>>, %arg3: memref<8x8xf32, #tpu.memory_space<vmem>>) attributes {dimension_semantics = [#tpu.dimension_semantics<parallel>], iteration_bounds = array<i64: 2>, scalar_prefetch = 0 : i64, scratch_operands = 0 : i64, tpu.core_type = #tpu.core_type<tc>, window_params = [{transform_indices = @transform_0, window_bounds = array<i64: 8, 32>}, {pipeline_mode = #tpu.pipeline_mode<synchronous>, transform_indices = @transform_1, window_bounds = array<i64: 32, 8>}, {transform_indices = @transform_2, window_bounds = array<i64: 8, 8>}]} {
    %c0 = arith.constant 0 : index
    %c0_0 = arith.constant 0 : index
    %0 = vector.load %arg1[%c0, %c0_0] : memref<8x32xf32, #tpu.memory_space<vmem>>, vector<8x32xf32>
    %c0_1 = arith.constant 0 : index
    %c0_2 = arith.constant 0 : index
    %1 = vector.load %arg2[%c0_1, %c0_2] : memref<32x8xf32, #tpu.memory_space<vmem>>, vector<32x8xf32>
    %cst = arith.constant dense<0.000000e+00> : vector<8x8xf32>
    %2 = tpu.matmul %0, %1, %cst {dimension_numbers = #tpu.dot_dimension_numbers<[1], [0], [0], [1], [0, 0, 1, 1], [], []>} : vector<8x32xf32>, vector<32x8xf32>, vector<8x8xf32> -> vector<8x8xf32>
    %c0_3 = arith.constant 0 : index
    %c0_4 = arith.constant 0 : index
    %3 = vector.load %arg3[%c0_3, %c0_4] : memref<8x8xf32, #tpu.memory_space<vmem>>, vector<8x8xf32>
    tpu.vector_store %arg3[%c0_3, %c0_4], %2 {strides = array<i32>} : memref<8x8xf32, #tpu.memory_space<vmem>>, vector<8x8xf32>,
    return
  }
  func.func @transform_0(%arg0: i32) -> (i32, i32) {
    %c0_i32 = arith.constant 0 : i32
    %c0_i32_0 = arith.constant 0 : i32
    return %arg0, %c0_i32 : i32, i32
  }
  func.func @transform_1(%arg0: i32) -> (i32, i32) {
    %c0_i32 = arith.constant 0 : i32
    %c0_i32_0 = arith.constant 0 : i32
    %c0_i32_1 = arith.constant 0 : i32
    return %c0_i32, %c0_i32_0 : i32, i32
  }
  func.func @transform_2(%arg0: i32) -> (i32, i32) {
    %c0_i32 = arith.constant 0 : i32
    %c0_i32_0 = arith.constant 0 : i32
    return %arg0, %c0_i32 : i32, i32
  }
}

</mosaic_0001>

<bundles_post_ra>
// kernel: tpu_custom_call.1
= control target key start
LH: loop header
LB: loop body
LE: loop exit
PB: predicated region body
PF: predicated region fallthrough
CT: control target
= control target key end

     0   :  { %s334_s9 = smov 0   ;;  %s363_s0 = inlined_call_operand.vmem [shape: f32[16,32], index: 0, kind: input, shape index: {}]   ;;  %s364_s1 = inlined_call_operand.vmem [shape: f32[32,8], index: 1, kind: input, shape index: {}]   ;;  %s365_s2 = inlined_call_operand.vmem [shape: f32[16,8], index: 2, kind: output, shape index: {}]  }
   0x1 LB: > { %s273_s10 = sadd.s32 4294967295, %s315_s9   ;;  %p277_p0 = scmp.ge.s32.totalorder %s315_s9, 1  ;;  %s315_s9 = sphi %s334_s9, %s12_s9  }
   0x2   : > { %p111_p1 = scmp.lt.s32.totalorder %s315_s9, 3 }
   0x4   : > { %p112_p2 = pnand %p277_p0, %p111_p1 }
   0x5   : > { %p131_p3 = scmp.lt.s32.totalorder (!%p112_p2), %s273_s10, 1 }
   0x6   : > { %115 = sbr.rel (%p112_p2) target bundleno = 215 (0xd7), region = 28 }
   0xb   : > { %v143_v0 = vld [vmem:[%s364_s1 + $0x18] sm:$0xff]  ;;  %v317_v1 = vmov 0.0   ;;  %v142_v2 = vld [vmem:[%s364_s1 + $0x10] sm:$0xff]  ;;  %vm318_vm0 = vmmov 0   ;;  %s367_s10 = smov (!%p131_p3, %s273_s10), 1  ;;  %v141_v3 = vld [vmem:[%s364_s1 + $0x8] sm:$0xff] }
   0xc   : > { %288 = vmatprep.subr.mxu0 %v317_v1  ;;  %296 = vmatprep.mubr.msk.f32.mxu0 %vm318_vm0, %v317_v1  ;;  %s278_s17 = sshll.u32 %s367_s10, 3  ;;  %v140_v4 = vld [vmem:[%s364_s1] sm:$0xff]  ;;  %vm144_vm1 = vcmask 261120   ;;  %vm218_vm2 = vcmask 64512  }
   0xd   : > { %289 = vmatpush3.msra.mxu0 %v143_v0  ;;  %s134_s22 = scalar_lea.vmem %s363_s0, %s278_s17  ;;  %s138_s25 = scalar_lea.vmem %s365_s2, %s278_s17 }
   0xe   : > { %290 = vmatprep.subr.mxu0 %v317_v1  ;;  %v139_v5 = vld [vmem:[%s134_s22] sm:$0xff] }
   0xf   : > { %291 = vmatpush3.msra.mxu0 %v142_v2 }
  0x10   : > { %292 = vmatprep.subr.mxu0 %v317_v1 }
  0x11   : > { %293 = vmatpush3.msra.mxu0 %v141_v3 }
  0x12   : > { %294 = vmatprep.subr.mxu0 %v317_v1 }
  0x13   : > { %295 = vmatpush3.msra.mxu0 %v140_v4 }
  0x14   : > { %297 = vmatmul.mubr.msk.f32.vlgmr.msra.gmra.mxu0 %vm144_vm1, %v139_v5 }
  0xd4   : > { %v214_v6 = vpop.f32.mrf.mxu0 }
  0xd5   : > { %219 = vst.msk [vmem:[%s138_s25] sm:$0xff] %vm218_vm2, %v214_v6 }
  0xd6   : > { %v298_v7 = vpop.f32.mrf.mxu0 }
  0xd7 PF: > { %s12_s9 = sadd.s32 1, %s315_s9  }
  0xd8   : > { %p9_p4 = scmp.ge.s32.totalorder %s12_s9, 4  }
  0xda   :  { %11 = sbr.rel (!%p9_p4) target bundleno = 1 (0x1), region = 58 }

</bundles_post_ra>
